<compile_context>
chip_gen: v7x
topology: tpu7x:2x2x1
jax: 0.10.0
libtpu: 0.0.40
codegen_flags: <defaults>
</compile_context>

<pallas_src>
import functools

import jax
import jax.numpy as jnp
from jax.experimental import pallas as pl
from jax.experimental.pallas import tpu as pltpu

LANE = 128  # lane width used for the packed (lane-dense) output


def _round_up(x, m):
    return (x + m - 1) // m * m


def _critic_kernel(x_ref, w1_ref, b1_ref, w2_ref, b2_ref,
                   w3_ref, b3_ref, w4_ref, b4_ref, o_ref):
    # Layers 1-3: bf16 MXU matmuls with f32 accumulation; f32 bias/ReLU (VPU).
    x = x_ref[...].astype(jnp.bfloat16)
    h = jnp.dot(x, w1_ref[...], preferred_element_type=jnp.float32)
    h = jnp.maximum(h + b1_ref[...], 0.0)
    h = jnp.dot(h.astype(jnp.bfloat16), w2_ref[...],
                preferred_element_type=jnp.float32)
    h = jnp.maximum(h + b2_ref[...], 0.0)
    h = jnp.dot(h.astype(jnp.bfloat16), w3_ref[...],
                preferred_element_type=jnp.float32)
    h = jnp.maximum(h + b3_ref[...], 0.0)

    # Layer 4 (256 -> 1): only one useful output column, so keep it off the
    # MXU: VPU broadcast-multiply by the w4 row, then an XLU lane reduction.
    hw = h * w4_ref[...]                       # (tb, H) f32, VPU
    tb, hdim = hw.shape
    # Major-dim split (layout preserving), then reduce over the lane axis to
    # produce the packed (tb//128, 128) critic values directly.
    y = jnp.sum(hw.reshape(tb // LANE, LANE, hdim), axis=-1)   # (tb//128, 128)
    o_ref[0] = (y + b4_ref[...]).astype(o_ref.dtype)


@functools.partial(jax.jit, static_argnames=("tile_b",))
def critic_forward(x, params, tile_b=1024):
    """x: [B, D_in] float32. params: dict of f32 (w, b) per layer (w: [in,out])."""
    B, d_in = x.shape
    w1, b1 = params["w1"], params["b1"]
    w2, b2 = params["w2"], params["b2"]
    w3, b3 = params["w3"], params["b3"]
    w4, b4 = params["w4"], params["b4"]
    H = w1.shape[1]          # 256

    # --- batch tile: multiple of 128 (packed output), >=2 grid steps when the
    # padded batch spans >= 256 rows (v7x megacore sharding). ---
    B128 = _round_up(B, LANE)
    tb = min(max(LANE, _round_up(tile_b, LANE)), B128)
    if B128 // tb < 2 and B128 >= 2 * LANE:
        tb = _round_up((B128 + 1) // 2, LANE)
    Bp = _round_up(B128, tb)
    grid_n = Bp // tb

    # --- operands: pad batch only when needed, bf16 weights, w4 as a row. ---
    xp = x if Bp == B else jnp.pad(x, ((0, Bp - B), (0, 0)))
    w1b = w1.astype(jnp.bfloat16)
    w2b = w2.astype(jnp.bfloat16)
    w3b = w3.astype(jnp.bfloat16)
    w4r = w4.reshape(1, H)                     # (1, 256) f32 row for VPU layer 4
    # b4 stays (1, 1) f32.
    # TODO(synk): on v6e/v7x a bf16 bias/ReLU epilogue would halve vreg
    # pressure; kept f32 here so the same kernel is safe on v5e.

    full = lambda i: (0, 0)              # weights/biases: same block every step
    batch_tile = lambda i: (i, 0)        # x: walk over batch tiles

    out = pl.pallas_call(
        _critic_kernel,
        out_shape=jax.ShapeDtypeStruct((grid_n, tb // LANE, LANE), jnp.float32),
        grid_spec=pl.GridSpec(
            grid=(grid_n,),
            in_specs=[
                pl.BlockSpec((tb, d_in), batch_tile),      # x
                pl.BlockSpec((d_in, H), full),             # w1 (bf16)
                pl.BlockSpec((1, H), full),                # b1 (f32)
                pl.BlockSpec((H, H), full),                # w2 (bf16)
                pl.BlockSpec((1, H), full),                # b2 (f32)
                pl.BlockSpec((H, H), full),                # w3 (bf16)
                pl.BlockSpec((1, H), full),                # b3 (f32)
                pl.BlockSpec((1, H), full),                # w4 row (f32)
                pl.BlockSpec((1, 1), full),                # b4 (f32)
            ],
            out_specs=pl.BlockSpec((1, tb // LANE, LANE), lambda i: (i, 0, 0)),
        ),
        compiler_params=pltpu.CompilerParams(
            dimension_semantics=("parallel",),
            vmem_limit_bytes=32 * 1024 * 1024),
    )(xp, w1b, b1, w2b, b2, w3b, b3, w4r, b4)

    # Unpack: (grid, tb//128, 128) row-major == flattened padded batch.
    return out.reshape(-1)[:B].reshape(B, 1)


def init_params(key, d_in, hidden=256):
    """Deterministic PyTorch-style init: U(-1/sqrt(fan_in), 1/sqrt(fan_in))."""
    sizes = [(d_in, hidden), (hidden, hidden), (hidden, hidden), (hidden, 1)]
    params = {}
    for idx, (fin, fout) in enumerate(sizes, start=1):
        key, kw, kb = jax.random.split(key, 3)
        bound = 1.0 / jnp.sqrt(jnp.float32(fin))
        params[f"w{idx}"] = jax.random.uniform(
            kw, (fin, fout), jnp.float32, -bound, bound)
        params[f"b{idx}"] = jax.random.uniform(
            kb, (1, fout), jnp.float32, -bound, bound)
    return params


def critic_reference_f32(x, params):
    h = jnp.maximum(x @ params["w1"] + params["b1"], 0.0)
    h = jnp.maximum(h @ params["w2"] + params["b2"], 0.0)
    h = jnp.maximum(h @ params["w3"] + params["b3"], 0.0)
    return h @ params["w4"] + params["b4"]


def critic_reference_bf16(x, params):
    """Reference matching the kernel's numerics (bf16 matmuls, f32 layer 4)."""
    bf = jnp.bfloat16
    h = jnp.dot(x.astype(bf), params["w1"].astype(bf),
                preferred_element_type=jnp.float32)
    h = jnp.maximum(h + params["b1"], 0.0)
    h = jnp.dot(h.astype(bf), params["w2"].astype(bf),
                preferred_element_type=jnp.float32)
    h = jnp.maximum(h + params["b2"], 0.0)
    h = jnp.dot(h.astype(bf), params["w3"].astype(bf),
                preferred_element_type=jnp.float32)
    h = jnp.maximum(h + params["b3"], 0.0)
    return h @ params["w4"] + params["b4"]


if __name__ == "__main__":
    # dims = {'o': 10, 'g': 5, 'u': 4}  -> in_features = 19
    dims_o, dims_g, dims_u = 10, 5, 4
    d_in = dims_o + dims_g + dims_u

    key = jax.random.PRNGKey(0)
    key, kp = jax.random.split(key)
    params = init_params(kp, d_in)

    # Small batch (single grid step; tile shrinks to the padded batch of 128).
    key, kx = jax.random.split(key)
    x_small = jax.random.normal(kx, (8, d_in), jnp.float32)
    out_small = jax.block_until_ready(critic_forward(x_small, params))
    assert out_small.shape == (8, 1)
    assert jnp.allclose(out_small, critic_reference_bf16(x_small, params),
                        atol=1e-2, rtol=2e-2)
    assert jnp.allclose(out_small, critic_reference_f32(x_small, params),
                        atol=5e-2, rtol=5e-2)

    # Ragged batch (zero-padding + 2-step parallel grid + packed output path).
    key, kx = jax.random.split(key)
    x_big = jax.random.normal(kx, (300, d_in), jnp.float32)
    out_big = jax.block_until_ready(critic_forward(x_big, params))
    assert out_big.shape == (300, 1)
    assert jnp.allclose(out_big, critic_reference_bf16(x_big, params),
                        atol=1e-2, rtol=2e-2)
    assert jnp.allclose(out_big, critic_reference_f32(x_big, params),
                        atol=5e-2, rtol=5e-2)

    print("KERNEL_OK")
</pallas_src>

<mosaic_0001>
module attributes {stable_mosaic.version = 11 : i64} {
  func.func @_critic_kernel(%arg0: i32, %arg1: memref<128x19xf32, #tpu.memory_space<vmem>>, %arg2: memref<19x256xbf16, #tpu.memory_space<vmem>>, %arg3: memref<1x256xf32, #tpu.memory_space<vmem>>, %arg4: memref<256x256xbf16, #tpu.memory_space<vmem>>, %arg5: memref<1x256xf32, #tpu.memory_space<vmem>>, %arg6: memref<256x256xbf16, #tpu.memory_space<vmem>>, %arg7: memref<1x256xf32, #tpu.memory_space<vmem>>, %arg8: memref<1x256xf32, #tpu.memory_space<vmem>>, %arg9: memref<1x1xf32, #tpu.memory_space<vmem>>, %arg10: memref<1x1x128xf32, #tpu.memory_space<vmem>>) attributes {dimension_semantics = [#tpu.dimension_semantics<parallel>], iteration_bounds = array<i64: 1>, scalar_prefetch = 0 : i64, scratch_operands = 0 : i64, tpu.core_type = #tpu.core_type<tc>, window_params = [{transform_indices = @transform_0, window_bounds = array<i64: 128, 19>}, {pipeline_mode = #tpu.pipeline_mode<synchronous>, transform_indices = @transform_1, window_bounds = array<i64: 19, 256>}, {pipeline_mode = #tpu.pipeline_mode<synchronous>, transform_indices = @transform_2, window_bounds = array<i64: 1, 256>}, {pipeline_mode = #tpu.pipeline_mode<synchronous>, transform_indices = @transform_3, window_bounds = array<i64: 256, 256>}, {pipeline_mode = #tpu.pipeline_mode<synchronous>, transform_indices = @transform_4, window_bounds = array<i64: 1, 256>}, {pipeline_mode = #tpu.pipeline_mode<synchronous>, transform_indices = @transform_5, window_bounds = array<i64: 256, 256>}, {pipeline_mode = #tpu.pipeline_mode<synchronous>, transform_indices = @transform_6, window_bounds = array<i64: 1, 256>}, {pipeline_mode = #tpu.pipeline_mode<synchronous>, transform_indices = @transform_7, window_bounds = array<i64: 1, 256>}, {pipeline_mode = #tpu.pipeline_mode<synchronous>, transform_indices = @transform_8, window_bounds = array<i64: 1, 1>}, {transform_indices = @transform_9, window_bounds = array<i64: 1, 1, 128>}]} {
    %c0 = arith.constant 0 : index
    %c0_0 = arith.constant 0 : index
    %0 = vector.load %arg1[%c0, %c0_0] : memref<128x19xf32, #tpu.memory_space<vmem>>, vector<128x19xf32>
    %1 = arith.truncf %0 : vector<128x19xf32> to vector<128x19xbf16>
    %c0_1 = arith.constant 0 : index
    %c0_2 = arith.constant 0 : index
    %2 = vector.load %arg2[%c0_1, %c0_2] : memref<19x256xbf16, #tpu.memory_space<vmem>>, vector<19x256xbf16>
    %cst = arith.constant dense<0.000000e+00> : vector<128x256xf32>
    %3 = tpu.matmul %1, %2, %cst {dimension_numbers = #tpu.dot_dimension_numbers<[1], [0], [0], [1], [0, 0, 1, 1], [], []>} : vector<128x19xbf16>, vector<19x256xbf16>, vector<128x256xf32> -> vector<128x256xf32>
    %c0_3 = arith.constant 0 : index
    %c0_4 = arith.constant 0 : index
    %4 = vector.load %arg3[%c0_3, %c0_4] : memref<1x256xf32, #tpu.memory_space<vmem>>, vector<1x256xf32>
    %5 = vector.broadcast %4 : vector<1x256xf32> to vector<128x256xf32>
    %6 = arith.addf %3, %5 : vector<128x256xf32>
    %cst_5 = arith.constant 0.000000e+00 : f32
    %7 = vector.broadcast %cst_5 : f32 to vector<128x256xf32>
    %8 = arith.maximumf %6, %7 : vector<128x256xf32>
    %9 = arith.truncf %8 : vector<128x256xf32> to vector<128x256xbf16>
    %c0_6 = arith.constant 0 : index
    %c0_7 = arith.constant 0 : index
    %10 = vector.load %arg4[%c0_6, %c0_7] : memref<256x256xbf16, #tpu.memory_space<vmem>>, vector<256x256xbf16>
    %cst_8 = arith.constant dense<0.000000e+00> : vector<128x256xf32>
    %11 = tpu.matmul %9, %10, %cst_8 {dimension_numbers = #tpu.dot_dimension_numbers<[1], [0], [0], [1], [0, 0, 1, 1], [], []>} : vector<128x256xbf16>, vector<256x256xbf16>, vector<128x256xf32> -> vector<128x256xf32>
    %c0_9 = arith.constant 0 : index
    %c0_10 = arith.constant 0 : index
    %12 = vector.load %arg5[%c0_9, %c0_10] : memref<1x256xf32, #tpu.memory_space<vmem>>, vector<1x256xf32>
    %13 = vector.broadcast %12 : vector<1x256xf32> to vector<128x256xf32>
    %14 = arith.addf %11, %13 : vector<128x256xf32>
    %cst_11 = arith.constant 0.000000e+00 : f32
    %15 = vector.broadcast %cst_11 : f32 to vector<128x256xf32>
    %16 = arith.maximumf %14, %15 : vector<128x256xf32>
    %17 = arith.truncf %16 : vector<128x256xf32> to vector<128x256xbf16>
    %c0_12 = arith.constant 0 : index
    %c0_13 = arith.constant 0 : index
    %18 = vector.load %arg6[%c0_12, %c0_13] : memref<256x256xbf16, #tpu.memory_space<vmem>>, vector<256x256xbf16>
    %cst_14 = arith.constant dense<0.000000e+00> : vector<128x256xf32>
    %19 = tpu.matmul %17, %18, %cst_14 {dimension_numbers = #tpu.dot_dimension_numbers<[1], [0], [0], [1], [0, 0, 1, 1], [], []>} : vector<128x256xbf16>, vector<256x256xbf16>, vector<128x256xf32> -> vector<128x256xf32>
    %c0_15 = arith.constant 0 : index
    %c0_16 = arith.constant 0 : index
    %20 = vector.load %arg7[%c0_15, %c0_16] : memref<1x256xf32, #tpu.memory_space<vmem>>, vector<1x256xf32>
    %21 = vector.broadcast %20 : vector<1x256xf32> to vector<128x256xf32>
    %22 = arith.addf %19, %21 : vector<128x256xf32>
    %cst_17 = arith.constant 0.000000e+00 : f32
    %23 = vector.broadcast %cst_17 : f32 to vector<128x256xf32>
    %24 = arith.maximumf %22, %23 : vector<128x256xf32>
    %c0_18 = arith.constant 0 : index
    %c0_19 = arith.constant 0 : index
    %25 = vector.load %arg8[%c0_18, %c0_19] : memref<1x256xf32, #tpu.memory_space<vmem>>, vector<1x256xf32>
    %26 = vector.broadcast %25 : vector<1x256xf32> to vector<128x256xf32>
    %27 = arith.mulf %24, %26 : vector<128x256xf32>
    %28 = vector.shape_cast %27 : vector<128x256xf32> to vector<1x128x256xf32>
    %cst_20 = arith.constant dense<0.000000e+00> : vector<1x128xf32>
    %29 = vector.multi_reduction <add>, %28, %cst_20 [2] : vector<1x128x256xf32> to vector<1x128xf32>
    %c0_21 = arith.constant 0 : index
    %c0_22 = arith.constant 0 : index
    %30 = vector.load %arg9[%c0_21, %c0_22] : memref<1x1xf32, #tpu.memory_space<vmem>>, vector<1x1xf32>
    %31 = vector.broadcast %30 : vector<1x1xf32> to vector<1x128xf32>
    %32 = arith.addf %29, %31 : vector<1x128xf32>
    %c0_23 = arith.constant 0 : index
    %c0_24 = arith.constant 0 : index
    %c0_25 = arith.constant 0 : index
    %33 = vector.load %arg10[%c0_23, %c0_24, %c0_25] : memref<1x1x128xf32, #tpu.memory_space<vmem>>, vector<1x1x128xf32>
    %34 = vector.shape_cast %33 : vector<1x1x128xf32> to vector<1x128xf32>
    %35 = vector.shape_cast %32 : vector<1x128xf32> to vector<1x1x128xf32>
    tpu.vector_store %arg10[%c0_23, %c0_24, %c0_25], %35 {strides = array<i32>} : memref<1x1x128xf32, #tpu.memory_space<vmem>>, vector<1x1x128xf32>,
    return
  }
  func.func @transform_0(%arg0: i32) -> (i32, i32) {
    %c0_i32 = arith.constant 0 : i32
    %c0_i32_0 = arith.constant 0 : i32
    return %arg0, %c0_i32 : i32, i32
  }
  func.func @transform_1(%arg0: i32) -> (i32, i32) {
    %c0_i32 = arith.constant 0 : i32
    %c0_i32_0 = arith.constant 0 : i32
    %c0_i32_1 = arith.constant 0 : i32
    return %c0_i32, %c0_i32_0 : i32, i32
  }
  func.func @transform_2(%arg0: i32) -> (i32, i32) {
    %c0_i32 = arith.constant 0 : i32
    %c0_i32_0 = arith.constant 0 : i32
    %c0_i32_1 = arith.constant 0 : i32
    return %c0_i32, %c0_i32_0 : i32, i32
  }
  func.func @transform_3(%arg0: i32) -> (i32, i32) {
    %c0_i32 = arith.constant 0 : i32
    %c0_i32_0 = arith.constant 0 : i32
    %c0_i32_1 = arith.constant 0 : i32
    return %c0_i32, %c0_i32_0 : i32, i32
  }
  func.func @transform_4(%arg0: i32) -> (i32, i32) {
    %c0_i32 = arith.constant 0 : i32
    %c0_i32_0 = arith.constant 0 : i32
    %c0_i32_1 = arith.constant 0 : i32
    return %c0_i32, %c0_i32_0 : i32, i32
  }
  func.func @transform_5(%arg0: i32) -> (i32, i32) {
    %c0_i32 = arith.constant 0 : i32
    %c0_i32_0 = arith.constant 0 : i32
    %c0_i32_1 = arith.constant 0 : i32
    return %c0_i32, %c0_i32_0 : i32, i32
  }
  func.func @transform_6(%arg0: i32) -> (i32, i32) {
    %c0_i32 = arith.constant 0 : i32
    %c0_i32_0 = arith.constant 0 : i32
    %c0_i32_1 = arith.constant 0 : i32
    return %c0_i32, %c0_i32_0 : i32, i32
  }
  func.func @transform_7(%arg0: i32) -> (i32, i32) {
    %c0_i32 = arith.constant 0 : i32
    %c0_i32_0 = arith.constant 0 : i32
    %c0_i32_1 = arith.constant 0 : i32
    return %c0_i32, %c0_i32_0 : i32, i32
  }
  func.func @transform_8(%arg0: i32) -> (i32, i32) {
    %c0_i32 = arith.constant 0 : i32
    %c0_i32_0 = arith.constant 0 : i32
    %c0_i32_1 = arith.constant 0 : i32
    return %c0_i32, %c0_i32_0 : i32, i32
  }
  func.func @transform_9(%arg0: i32) -> (i32, i32, i32) {
    %c0_i32 = arith.constant 0 : i32
    %c0_i32_0 = arith.constant 0 : i32
    %c0_i32_1 = arith.constant 0 : i32
    return %arg0, %c0_i32, %c0_i32_0 : i32, i32, i32
  }
}

</mosaic_0001>

<bundles_post_ra>
// kernel: critic_forward.1
= control target key start
LH: loop header
LB: loop body
LE: loop exit
PB: predicated region body
PF: predicated region fallthrough
CT: control target
= control target key end

     0   :  { %vm114_vm0 = vcmask 1040384   ;;  %vm115_vm1 = vcmask 1041408   ;;  %v1431_v1 = vmov 65535   ;;  %v1432_v3 = vmov 0   ;;  %s1986_s1 = inlined_call_operand.vmem [shape: bf16[19,256], index: 1, kind: input, shape index: {}]   ;;  %s1987_s0 = inlined_call_operand.vmem [shape: f32[128,19], index: 0, kind: input, shape index: {}]   ;;  %s1988_s3 = inlined_call_operand.vmem [shape: bf16[256,256], index: 3, kind: input, shape index: {}]   ;;  %s1989_s5 = inlined_call_operand.vmem [shape: bf16[256,256], index: 5, kind: input, shape index: {}]   ;;  %s1990_s2 = inlined_call_operand.vmem [shape: f32[1,256], index: 2, kind: input, shape index: {}]   ;;  %s1991_s4 = inlined_call_operand.vmem [shape: f32[1,256], index: 4, kind: input, shape index: {}]   ;;  %s1992_s8 = inlined_call_operand.<no memory space> [shape: f32[1,1], index: 8, kind: input, shape index: {}]   ;;  %s1993_s6 = inlined_call_operand.vmem [shape: f32[1,256], index: 6, kind: input, shape index: {}]   ;;  %s1994_s7 = inlined_call_operand.vmem [shape: f32[1,256], index: 7, kind: input, shape index: {}]   ;;  %s1995_s9 = inlined_call_operand.vmem [shape: f32[1,1,128], index: 9, kind: output, shape index: {}]  }
   0x1   :  { %v61_v0 = vld [vmem:[%s1986_s1 + $0x10] sm:$0x33]  ;;  %v116_v2 = vsel %vm114_vm0, 4294967295, %v1431_v1  ;;  %156 = vmatprep.mubr.bf16.mxu0 %v1432_v3  ;;  %1328 = vset.pattern.permute.xlu1 %v1432_v3  ;;  %v1330_v4 = vld [vmem:[%s1986_s1 + $0x4] ss:$8 sps:$4 sm:$0xff]   ;;  %vm89_vm2 = vcmask 154624  }
   0x2   :  { %v1332_v5 = vld [vmem:[%s1986_s1] ss:$8 sps:$4 sm:$0xff]   ;;  %v1253_v6 = vcombine.high %v61_v0, %v61_v0  ;;  %v117_v7 = vsel %vm115_vm1, %v116_v2, 0  ;;  %v1252_v8 = vcombine.low %v61_v0, %v61_v0  ;;  %1329 = vset.pattern.permute.xlu0 %v1432_v3  ;;  %124 = vmatprep.subr.bf16.mxu0 %v1330_v4  ;;  %v1335_v14 = vld [vmem:[%s1988_s3 + $0x4] ss:$8 sps:$4 sm:$0xff]   ;;  %v37_v17 = vld [vmem:[%s1987_s0 + $0x10] sm:$0xff] }
   0x3   :  { %125 = vmatpush1.bf16.msra.mxu0 %v1332_v5  ;;  %v35_v11 = vld [vmem:[%s1987_s0] sm:$0xff]  ;;  %v36_v12 = vld [vmem:[%s1987_s0 + $0x8] sm:$0xff]  ;;  %489 = vmatprep.subr.bf16.mxu1 %v1335_v14  ;;  %v1338_v16 = vld [vmem:[%s1988_s3 + $0x14] ss:$8 sps:$4 sm:$0xff]   ;;  %vm1144_vm3 = vcmask 130112   ;;  %vm1151_vm4 = vcmask 195712  }
   0x4   :  { %v122_v9 = vand.u32 %v1253_v6, %v117_v7  ;;  %v119_v10 = vand.u32 %v1252_v8, %v117_v7  ;;  %v51_v13 = vpack.c.bf16 %v36_v12, %v35_v11  ;;  %v1337_v15 = vld [vmem:[%s1988_s3] ss:$8 sps:$4 sm:$0xff]   ;;  %v1340_v18 = vld [vmem:[%s1988_s3 + $0x10] ss:$8 sps:$4 sm:$0xff]   ;;  %v1341_v19 = vld [vmem:[%s1988_s3 + $0x24] ss:$8 sps:$4 sm:$0xff]  }
   0x5   :  { %490 = vmatpush1.bf16.msra.mxu1 %v1337_v15  ;;  %v38_v20 = vld [vmem:[%s1987_s0 + $0x18] sm:$0xff]  ;;  %v1343_v21 = vld [vmem:[%s1988_s3 + $0x20] ss:$8 sps:$4 sm:$0xff]   ;;  %v1347_v26 = vld [vmem:[%s1988_s3 + $0x44] ss:$8 sps:$4 sm:$0xff]   ;;  %vm1158_vm5 = vcmask 261312  }
   0x6   :  { %126 = vmatprep.subr.bf16.mxu0 %v122_v9  ;;  %491 = vmatprep.subr.bf16.mxu1 %v1338_v16  ;;  %v52_v22 = vpack.c.bf16 %v38_v20, %v37_v17  ;;  %v1344_v23 = vld [vmem:[%s1988_s3 + $0x34] ss:$8 sps:$4 sm:$0xff]   ;;  %v39_v24 = vld [vmem:[%s1987_s0 + $0x20] sm:$0xff]  ;;  %v1346_v25 = vld [vmem:[%s1988_s3 + $0x30] ss:$8 sps:$4 sm:$0xff]   ;;  %vm1165_vm6 = vcmask 326912  }
   0x7   :  { %127 = vmatpush1.bf16.msra.mxu0 %v119_v10  ;;  %v40_v27 = vld [vmem:[%s1987_s0 + $0x28] sm:$0xff]  ;;  %v1350_v30 = vld [vmem:[%s1988_s3 + $0x54] ss:$8 sps:$4 sm:$0xff]   ;;  %v1352_v31 = vld [vmem:[%s1988_s3 + $0x50] ss:$8 sps:$4 sm:$0xff]   ;;  %vm1172_vm7 = vcmask 392512  }
   0x8   :  { %v1349_v28 = vld [vmem:[%s1988_s3 + $0x40] ss:$8 sps:$4 sm:$0xff]   ;;  %v53_v29 = vpack.c.bf16 %v40_v27, %v39_v24  ;;  %v1353_v32 = vld [vmem:[%s1988_s3 + $0x64] ss:$8 sps:$4 sm:$0xff]   ;;  %v41_v33 = vld [vmem:[%s1987_s0 + $0x30] sm:$0xff]  ;;  %v64_v27 = vlaneseq  ;;  %vm1179_vm8 = vcmask 458112  }
   0x9   :  { %492 = vmatpush1.bf16.msra.mxu1 %v1340_v18  ;;  %v42_v34 = vld [vmem:[%s1987_s0 + $0x38] sm:$0xff]  ;;  %v1355_v35 = vld [vmem:[%s1988_s3 + $0x60] ss:$8 sps:$4 sm:$0xff]   ;;  %v1359_v39 = vld [vmem:[%s1988_s3 + $0x84] ss:$8 sps:$4 sm:$0xff]   ;;  %vm1186_vm9 = vcmask 523712  }
   0xa   :  { %1254 = vmatmul.mubr.msk.bf16.vlgmr.msra.gmra.mrb[0].mxu0 %vm89_vm2, %v51_v13  ;;  %493 = vmatprep.subr.bf16.mxu1 %v1341_v19  ;;  %v54_v36 = vpack.c.bf16 %v42_v34, %v41_v33  ;;  %v1356_v37 = vld [vmem:[%s1988_s3 + $0x74] ss:$8 sps:$4 sm:$0xff]   ;;  %v1358_v38 = vld [vmem:[%s1988_s3 + $0x70] ss:$8 sps:$4 sm:$0xff]   ;;  %v43_v40 = vld [vmem:[%s1987_s0 + $0x40] sm:$0xff]  ;;  %vm1193_vm10 = vcmask 589312  }
   0xb   :  { %166 = vmatprep.mubr.bf16.mxu0 %v1432_v3  ;;  %v44_v41 = vld [vmem:[%s1987_s0 + $0x48] sm:$0xff]  ;;  %v1362_v44 = vld [vmem:[%s1988_s3 + $0x94] ss:$8 sps:$4 sm:$0xff]   ;;  %v1364_v45 = vld [vmem:[%s1988_s3 + $0x90] ss:$8 sps:$4 sm:$0xff]   ;;  %vm1200_vm11 = vcmask 654912  }
   0xc   :  { %v1361_v42 = vld [vmem:[%s1988_s3 + $0x80] ss:$8 sps:$4 sm:$0xff]   ;;  %v55_v43 = vpack.c.bf16 %v44_v41, %v43_v40  ;;  %v1365_v46 = vld [vmem:[%s1988_s3 + $0xa4] ss:$8 sps:$4 sm:$0xff]   ;;  %v45_v47 = vld [vmem:[%s1987_s0 + $0x50] sm:$0xff]  ;;  %vm1207_vm12 = vcmask 720512  }
   0xd   :  { %494 = vmatpush1.bf16.msra.mxu1 %v1343_v21  ;;  %v46_v48 = vld [vmem:[%s1987_s0 + $0x58] sm:$0xff]  ;;  %v1367_v49 = vld [vmem:[%s1988_s3 + $0xa0] ss:$8 sps:$4 sm:$0xff]   ;;  %v1371_v53 = vld [vmem:[%s1988_s3 + $0xc4] ss:$8 sps:$4 sm:$0xff]   ;;  %vm1214_vm13 = vcmask 786112  }
   0xe   :  { %495 = vmatprep.subr.bf16.mxu1 %v1344_v23  ;;  %v56_v50 = vpack.c.bf16 %v46_v48, %v45_v47  ;;  %v1368_v51 = vld [vmem:[%s1988_s3 + $0xb4] ss:$8 sps:$4 sm:$0xff]   ;;  %v1370_v52 = vld [vmem:[%s1988_s3 + $0xb0] ss:$8 sps:$4 sm:$0xff]   ;;  %v47_v54 = vld [vmem:[%s1987_s0 + $0x60] sm:$0xff]  ;;  %vm1221_vm14 = vcmask 851712  }
   0xf   :  { %v48_v55 = vld [vmem:[%s1987_s0 + $0x68] sm:$0xff]  ;;  %v1374_v58 = vld [vmem:[%s1988_s3 + $0xd4] ss:$8 sps:$4 sm:$0xff]   ;;  %v1376_v62 = vld [vmem:[%s1988_s3 + $0xd0] ss:$8 sps:$4 sm:$0xff]   ;;  %vm1228_vm15 = vcmask 917312  }
  0x10   :  { %v1373_v56 = vld [vmem:[%s1988_s3 + $0xc0] ss:$8 sps:$4 sm:$0xff]   ;;  %v57_v57 = vpack.c.bf16 %v48_v55, %v47_v54  ;;  %v49_v59 = vld [vmem:[%s1987_s0 + $0x70] sm:$0xff]  ;;  %v50_v60 = vld [vmem:[%s1987_s0 + $0x78] sm:$0xff]  ;;  %vm1235_vm0 = vcmask 982912   ;;  %vm1242_vm1 = vcmask 1048512  }
  0x11   :  { %496 = vmatpush1.bf16.msra.mxu1 %v1346_v25  ;;  %v58_v61 = vpack.c.bf16 %v50_v60, %v49_v59  ;;  %v1377_v63 = vld [vmem:[%s1988_s3 + $0xe4] ss:$8 sps:$4 sm:$0xff]   ;;  %v1379_v0 = vld [vmem:[%s1988_s3 + $0xe0] ss:$8 sps:$4 sm:$0xff]   ;;  %v1380_v1 = vld [vmem:[%s1988_s3 + $0xf4] ss:$8 sps:$4 sm:$0xff]  }
  0x12   :  { %1255 = vmatmul.mubr.msk.bf16.gmra.mrb[4].mxu0 %vm89_vm2, %v52_v22  ;;  %497 = vmatprep.subr.bf16.mxu1 %v1347_v26  ;;  %v1382_v2 = vld [vmem:[%s1988_s3 + $0xf0] ss:$8 sps:$4 sm:$0xff]   ;;  %v1385_v4 = vld [vmem:[%s1989_s5 + $0x4] ss:$8 sps:$4 sm:$0xff]   ;;  %v1388_v5 = vld [vmem:[%s1989_s5 + $0x14] ss:$8 sps:$4 sm:$0xff]  }
  0x13   :  { %176 = vmatprep.mubr.bf16.mxu0 %v1432_v3  ;;  %854 = vmatprep.subr.bf16.mxu0 %v1385_v4  ;;  %v1386_v6 = vld [vmem:[%s1989_s5 + $0x10] ss:$8 sps:$4 sm:$0xff]   ;;  %v1391_v7 = vld [vmem:[%s1989_s5 + $0x24] ss:$8 sps:$4 sm:$0xff]   ;;  %v1389_v8 = vld [vmem:[%s1989_s5 + $0x20] ss:$8 sps:$4 sm:$0xff]  }
  0x14   :  { %v1394_v9 = vld [vmem:[%s1989_s5 + $0x34] ss:$8 sps:$4 sm:$0xff]   ;;  %v1392_v10 = vld [vmem:[%s1989_s5 + $0x30] ss:$8 sps:$4 sm:$0xff]   ;;  %v1397_v11 = vld [vmem:[%s1989_s5 + $0x44] ss:$8 sps:$4 sm:$0xff]  }
  0x15   :  { %498 = vmatpush1.bf16.msra.mxu1 %v1349_v28  ;;  %v1395_v12 = vld [vmem:[%s1989_s5 + $0x40] ss:$8 sps:$4 sm:$0xff]   ;;  %v1400_v13 = vld [vmem:[%s1989_s5 + $0x54] ss:$8 sps:$4 sm:$0xff]   ;;  %v1398_v14 = vld [vmem:[%s1989_s5 + $0x50] ss:$8 sps:$4 sm:$0xff]  }
  0x16   :  { %499 = vmatprep.subr.bf16.mxu1 %v1350_v30  ;;  %v1403_v15 = vld [vmem:[%s1989_s5 + $0x64] ss:$8 sps:$4 sm:$0xff]   ;;  %v1401_v16 = vld [vmem:[%s1989_s5 + $0x60] ss:$8 sps:$4 sm:$0xff]   ;;  %v1406_v17 = vld [vmem:[%s1989_s5 + $0x74] ss:$8 sps:$4 sm:$0xff]  }
  0x17   :  { %v1404_v18 = vld [vmem:[%s1989_s5 + $0x70] ss:$8 sps:$4 sm:$0xff]   ;;  %v1409_v19 = vld [vmem:[%s1989_s5 + $0x84] ss:$8 sps:$4 sm:$0xff]   ;;  %v1407_v20 = vld [vmem:[%s1989_s5 + $0x80] ss:$8 sps:$4 sm:$0xff]  }
  0x18   :  { %v1412_v21 = vld [vmem:[%s1989_s5 + $0x94] ss:$8 sps:$4 sm:$0xff]   ;;  %v1410_v22 = vld [vmem:[%s1989_s5 + $0x90] ss:$8 sps:$4 sm:$0xff]   ;;  %v1415_v23 = vld [vmem:[%s1989_s5 + $0xa4] ss:$8 sps:$4 sm:$0xff]  }
  0x19   :  { %500 = vmatpush1.bf16.msra.mxu1 %v1352_v31  ;;  %v1413_v24 = vld [vmem:[%s1989_s5 + $0xa0] ss:$8 sps:$4 sm:$0xff]   ;;  %v1418_v25 = vld [vmem:[%s1989_s5 + $0xb4] ss:$8 sps:$4 sm:$0xff]   ;;  %v1416_v26 = vld [vmem:[%s1989_s5 + $0xb0] ss:$8 sps:$4 sm:$0xff]  }
  0x1a   :  { %1256 = vmatmul.mubr.msk.bf16.gmra.mrb[8].mxu0 %vm89_vm2, %v53_v29  ;;  %501 = vmatprep.subr.bf16.mxu1 %v1353_v32  ;;  %v1421_v28 = vld [vmem:[%s1989_s5 + $0xc4] ss:$8 sps:$4 sm:$0xff]   ;;  %v1419_v29 = vld [vmem:[%s1989_s5 + $0xc0] ss:$8 sps:$4 sm:$0xff]   ;;  %v1733_v30 = vshrl.u32 %v64_v27, 7 }
  0x1b   :  { %186 = vmatprep.mubr.bf16.mxu0 %v1432_v3  ;;  %v1424_v31 = vld [vmem:[%s1989_s5 + $0xd4] ss:$8 sps:$4 sm:$0xff]   ;;  %v1422_v32 = vld [vmem:[%s1989_s5 + $0xd0] ss:$8 sps:$4 sm:$0xff]   ;;  %v62_v34 = vld [vmem:[%s1990_s2] sm:$0x3] }
  0x1c   :  { %v1742_v33 = vsub.s32 0, %v1733_v30 }
  0x1d   :  { %502 = vmatpush1.bf16.msra.mxu1 %v1355_v35  ;;  %v1748_v35 = vsub.s32 1, %v1733_v30 }
  0x1e   :  { %503 = vmatprep.subr.bf16.mxu1 %v1356_v37 }
  0x1f   :  { %v1754_v37 = vrot.slane %v62_v34, %v1748_v35 }
  0x21   :  { %504 = vmatpush1.bf16.msra.mxu1 %v1358_v38 }
  0x22   :  { %1257 = vmatmul.mubr.msk.bf16.gmra.mrb[12].mxu0 %vm89_vm2, %v54_v36  ;;  %505 = vmatprep.subr.bf16.mxu1 %v1359_v39  ;;  %v1751_v36 = vrot.slane %v62_v34, %v1742_v33 }
  0x23   :  { %196 = vmatprep.mubr.bf16.mxu0 %v1432_v3 }
  0x25   :  { %506 = vmatpush1.bf16.msra.mxu1 %v1361_v42 }
  0x26   :  { %507 = vmatprep.subr.bf16.mxu1 %v1362_v44 }
  0x29   :  { %508 = vmatpush1.bf16.msra.mxu1 %v1364_v45 }
  0x2a   :  { %1258 = vmatmul.mubr.msk.bf16.gmra.mrb[16].mxu0 %vm89_vm2, %v55_v43  ;;  %509 = vmatprep.subr.bf16.mxu1 %v1365_v46 }
  0x2b   :  { %206 = vmatprep.mubr.bf16.mxu0 %v1432_v3 }
  0x2d   :  { %510 = vmatpush1.bf16.msra.mxu1 %v1367_v49 }
  0x2e   :  { %511 = vmatprep.subr.bf16.mxu1 %v1368_v51 }
  0x31   :  { %512 = vmatpush1.bf16.msra.mxu1 %v1370_v52 }
  0x32   :  { %1259 = vmatmul.mubr.msk.bf16.gmra.mrb[20].mxu0 %vm89_vm2, %v56_v50  ;;  %513 = vmatprep.subr.bf16.mxu1 %v1371_v53 }
  0x33   :  { %216 = vmatprep.mubr.bf16.mxu0 %v1432_v3 }
  0x35   :  { %514 = vmatpush1.bf16.msra.mxu1 %v1373_v56 }
  0x36   :  { %515 = vmatprep.subr.bf16.mxu1 %v1374_v58 }
  0x39   :  { %516 = vmatpush1.bf16.msra.mxu1 %v1376_v62 }
  0x3a   :  { %1260 = vmatmul.mubr.msk.bf16.gmra.mrb[24].mxu0 %vm89_vm2, %v57_v57  ;;  %517 = vmatprep.subr.bf16.mxu1 %v1377_v63 }
  0x3b   :  { %226 = vmatprep.mubr.bf16.mxu0 %v1432_v3  ;;  %v1383_v3 = vld [vmem:[%s1989_s5] ss:$8 sps:$4 sm:$0xff]  }
  0x3c   :  { %855 = vmatpush1.bf16.msra.mxu0 %v1383_v3 }
  0x3d   :  { %518 = vmatpush1.bf16.msra.mxu1 %v1379_v0  ;;  %856 = vmatprep.subr.bf16.mxu0 %v1388_v5 }
  0x3e   :  { %519 = vmatprep.subr.bf16.mxu1 %v1380_v1 }
  0x40   :  { %857 = vmatpush1.bf16.msra.mxu0 %v1386_v6 }
  0x41   :  { %520 = vmatpush1.bf16.msra.mxu1 %v1382_v2  ;;  %858 = vmatprep.subr.bf16.mxu0 %v1391_v7 }
  0x42   :  { %1261 = vmatmul.mubr.msk.bf16.gmra.mrb[28].mxu0 %vm89_vm2, %v58_v61 }
  0x44   :  { %859 = vmatpush1.bf16.msra.mxu0 %v1389_v8 }
  0x45   :  { %860 = vmatprep.subr.bf16.mxu0 %v1394_v9 }
  0x48   :  { %861 = vmatpush1.bf16.msra.mxu0 %v1392_v10 }
  0x49   :  { %862 = vmatprep.subr.bf16.mxu0 %v1397_v11 }
  0x4c   :  { %863 = vmatpush1.bf16.msra.mxu0 %v1395_v12 }
  0x4d   :  { %864 = vmatprep.subr.bf16.mxu0 %v1400_v13 }
  0x50   :  { %865 = vmatpush1.bf16.msra.mxu0 %v1398_v14 }
  0x51   :  { %866 = vmatprep.subr.bf16.mxu0 %v1403_v15 }
  0x54   :  { %867 = vmatpush1.bf16.msra.mxu0 %v1401_v16 }
  0x55   :  { %868 = vmatprep.subr.bf16.mxu0 %v1406_v17 }
  0x58   :  { %869 = vmatpush1.bf16.msra.mxu0 %v1404_v18 }
  0x59   :  { %870 = vmatprep.subr.bf16.mxu0 %v1409_v19 }
  0x5c   :  { %871 = vmatpush1.bf16.msra.mxu0 %v1407_v20 }
  0x5d   :  { %872 = vmatprep.subr.bf16.mxu0 %v1412_v21 }
  0x60   :  { %873 = vmatpush1.bf16.msra.mxu0 %v1410_v22 }
  0x61   :  { %874 = vmatprep.subr.bf16.mxu0 %v1415_v23 }
  0x64   :  { %875 = vmatpush1.bf16.msra.mxu0 %v1413_v24 }
  0x65   :  { %876 = vmatprep.subr.bf16.mxu0 %v1418_v25 }
  0x68   :  { %877 = vmatpush1.bf16.msra.mxu0 %v1416_v26 }
  0x69   :  { %878 = vmatprep.subr.bf16.mxu0 %v1421_v28 }
  0x6c   :  { %879 = vmatpush1.bf16.msra.mxu0 %v1419_v29 }
  0x6d   :  { %880 = vmatprep.subr.bf16.mxu0 %v1424_v31 }
  0x70   :  { %881 = vmatpush1.bf16.msra.mxu0 %v1422_v32 }
  0xdd   :  { %v158_v38 = vpop.f32.mrb[0].mxu0 }
  0xde   :  { %v159_v39 = vadd.f32 %v158_v38, %v1751_v36  ;;  %v160_v40 = vpop.f32.mrb[1].mxu0 }
  0xdf   :  { %v161_v41 = vadd.f32 %v160_v40, %v1754_v37  ;;  %v162_v42 = vpop.f32.mrb[2].mxu0 }
  0xe0   :  { %v163_v43 = vadd.f32 %v162_v42, %v1751_v36  ;;  %v164_v44 = vpop.f32.mrb[3].mxu0  ;;  %v237_v46 = vmax.f32 %v159_v39, 0.0 }
  0xe1   :  { %v165_v45 = vadd.f32 %v164_v44, %v1754_v37  ;;  %v238_v48 = vmax.f32 %v161_v41, 0.0 }
  0xe2   :  { %v239_v47 = vmax.f32 %v163_v43, 0.0 }
  0xe3   :  { %v240_v49 = vmax.f32 %v165_v45, 0.0 }
  0xe4   :  { %v269_v50 = vpack.c.bf16 %v239_v47, %v237_v46 }
  0xe5   :  { %v168_v51 = vpop.f32.mrb[4].mxu0  ;;  %v270_v52 = vpack.c.bf16 %v240_v49, %v238_v48 }
  0xe6   :  { %v169_v53 = vadd.f32 %v168_v51, %v1751_v36  ;;  %v170_v54 = vpop.f32.mrb[5].mxu0 }
  0xe7   :  { %v171_v55 = vadd.f32 %v170_v54, %v1754_v37  ;;  %v172_v56 = vpop.f32.mrb[6].mxu0  ;;  %521 = vmatprep.mubr.bf16.mxu1 %v270_v52 }
  0xe8   :  { %v173_v57 = vadd.f32 %v172_v56, %v1751_v36  ;;  %v174_v58 = vpop.f32.mrb[7].mxu0  ;;  %522 = vmatmul.mubr.bf16.vlgmr.msra.gmra.mrb[0].mxu1 %v269_v50  ;;  %v241_v60 = vmax.f32 %v169_v53, 0.0 }
  0xe9   :  { %v175_v59 = vadd.f32 %v174_v58, %v1754_v37  ;;  %v242_v62 = vmax.f32 %v171_v55, 0.0 }
  0xea   :  { %v243_v61 = vmax.f32 %v173_v57, 0.0 }
  0xeb   :  { %v244_v63 = vmax.f32 %v175_v59, 0.0 }
  0xec   :  { %v271_v0 = vpack.c.bf16 %v243_v61, %v241_v60 }
  0xed   :  { %v272_v1 = vpack.c.bf16 %v244_v63, %v242_v62  ;;  %v178_v2 = vpop.f32.mrb[8].mxu0 }
  0xee   :  { %v179_v3 = vadd.f32 %v178_v2, %v1751_v36  ;;  %v180_v4 = vpop.f32.mrb[9].mxu0 }
  0xef   :  { %v181_v5 = vadd.f32 %v180_v4, %v1754_v37  ;;  %v182_v6 = vpop.f32.mrb[10].mxu0  ;;  %531 = vmatprep.mubr.bf16.mxu1 %v272_v1 }
  0xf0   :  { %v183_v7 = vadd.f32 %v182_v6, %v1751_v36  ;;  %v184_v8 = vpop.f32.mrb[11].mxu0  ;;  %532 = vmatmul.mubr.bf16.gmra.mrb[4].mxu1 %v271_v0  ;;  %v245_v10 = vmax.f32 %v179_v3, 0.0 }
  0xf1   :  { %v185_v9 = vadd.f32 %v184_v8, %v1754_v37  ;;  %v246_v12 = vmax.f32 %v181_v5, 0.0 }
  0xf2   :  { %v247_v11 = vmax.f32 %v183_v7, 0.0 }
  0xf3   :  { %v248_v13 = vmax.f32 %v185_v9, 0.0 }
  0xf4   :  { %v273_v14 = vpack.c.bf16 %v247_v11, %v245_v10 }
  0xf5   :  { %v274_v15 = vpack.c.bf16 %v248_v13, %v246_v12  ;;  %v188_v16 = vpop.f32.mrb[12].mxu0 }
  0xf6   :  { %v189_v17 = vadd.f32 %v188_v16, %v1751_v36  ;;  %v190_v18 = vpop.f32.mrb[13].mxu0 }
  0xf7   :  { %v191_v19 = vadd.f32 %v190_v18, %v1754_v37  ;;  %v192_v20 = vpop.f32.mrb[14].mxu0  ;;  %541 = vmatprep.mubr.bf16.mxu1 %v274_v15 }
  0xf8   :  { %v249_v21 = vmax.f32 %v189_v17, 0.0  ;;  %v193_v22 = vadd.f32 %v192_v20, %v1751_v36  ;;  %v194_v23 = vpop.f32.mrb[15].mxu0  ;;  %542 = vmatmul.mubr.bf16.gmra.mrb[8].mxu1 %v273_v14 }
  0xf9   :  { %v250_v24 = vmax.f32 %v191_v19, 0.0  ;;  %v195_v25 = vadd.f32 %v194_v23, %v1754_v37 }
  0xfa   :  { %v251_v26 = vmax.f32 %v193_v22, 0.0 }
  0xfb   :  { %v252_v28 = vmax.f32 %v195_v25, 0.0 }
  0xfc   :  { %v275_v29 = vpack.c.bf16 %v251_v26, %v249_v21 }
  0xfd   :  { %v276_v31 = vpack.c.bf16 %v252_v28, %v250_v24  ;;  %v198_v32 = vpop.f32.mrb[16].mxu0 }
  0xfe   :  { %v199_v34 = vadd.f32 %v198_v32, %v1751_v36  ;;  %v200_v38 = vpop.f32.mrb[17].mxu0  ;;  %v317_v32 = vld [vmem:[%s1991_s4] sm:$0x3] }
  0xff   :  { %v201_v39 = vadd.f32 %v200_v38, %v1754_v37  ;;  %v202_v40 = vpop.f32.mrb[18].mxu0  ;;  %551 = vmatprep.mubr.bf16.mxu1 %v276_v31  ;;  %v1425_v31 = vld [vmem:[%s1989_s5 + $0xe0] ss:$8 sps:$4 sm:$0xff]   ;;  %v1807_v38 = vrot.slane %v317_v32, %v1748_v35 }
 0x100   :  { %v253_v41 = vmax.f32 %v199_v34, 0.0  ;;  %v203_v42 = vadd.f32 %v202_v40, %v1751_v36  ;;  %v204_v43 = vpop.f32.mrb[19].mxu0  ;;  %552 = vmatmul.mubr.bf16.gmra.mrb[12].mxu1 %v275_v29  ;;  %v1427_v29 = vld [vmem:[%s1989_s5 + $0xe4] ss:$8 sps:$4 sm:$0xff]   ;;  %v1804_v34 = vrot.slane %v317_v32, %v1742_v33 }
 0x101   :  { %v254_v44 = vmax.f32 %v201_v39, 0.0  ;;  %v205_v45 = vadd.f32 %v204_v43, %v1754_v37  ;;  %882 = vmatprep.subr.bf16.mxu0 %v1427_v29 }
 0x102   :  { %v255_v46 = vmax.f32 %v203_v42, 0.0  ;;  %883 = vmatpush1.bf16.msra.mxu0 %v1425_v31 }
 0x103   :  { %v256_v47 = vmax.f32 %v205_v45, 0.0 }
 0x104   :  { %v277_v48 = vpack.c.bf16 %v255_v46, %v253_v41 }
 0x105   :  { %v278_v49 = vpack.c.bf16 %v256_v47, %v254_v44  ;;  %v208_v50 = vpop.f32.mrb[20].mxu0 }
 0x106   :  { %v209_v51 = vadd.f32 %v208_v50, %v1751_v36  ;;  %v210_v52 = vpop.f32.mrb[21].mxu0 }
 0x107   :  { %v211_v53 = vadd.f32 %v210_v52, %v1754_v37  ;;  %v212_v54 = vpop.f32.mrb[22].mxu0  ;;  %561 = vmatprep.mubr.bf16.mxu1 %v278_v49 }
 0x108   :  { %v257_v55 = vmax.f32 %v209_v51, 0.0  ;;  %v213_v56 = vadd.f32 %v212_v54, %v1751_v36  ;;  %v214_v57 = vpop.f32.mrb[23].mxu0  ;;  %562 = vmatmul.mubr.bf16.gmra.mrb[16].mxu1 %v277_v48 }
 0x109   :  { %v258_v58 = vmax.f32 %v211_v53, 0.0  ;;  %v215_v59 = vadd.f32 %v214_v57, %v1754_v37 }
 0x10a   :  { %v259_v60 = vmax.f32 %v213_v56, 0.0 }
 0x10b   :  { %v260_v61 = vmax.f32 %v215_v59, 0.0 }
 0x10c   :  { %v279_v62 = vpack.c.bf16 %v259_v60, %v257_v55 }
 0x10d   :  { %v280_v63 = vpack.c.bf16 %v260_v61, %v258_v58  ;;  %v218_v0 = vpop.f32.mrb[24].mxu0 }
 0x10e   :  { %v219_v1 = vadd.f32 %v218_v0, %v1751_v36  ;;  %v220_v2 = vpop.f32.mrb[25].mxu0 }
 0x10f   :  { %v221_v3 = vadd.f32 %v220_v2, %v1754_v37  ;;  %v222_v4 = vpop.f32.mrb[26].mxu0  ;;  %571 = vmatprep.mubr.bf16.mxu1 %v280_v63 }
 0x110   :  { %v261_v5 = vmax.f32 %v219_v1, 0.0  ;;  %v223_v6 = vadd.f32 %v222_v4, %v1751_v36  ;;  %v224_v7 = vpop.f32.mrb[27].mxu0  ;;  %572 = vmatmul.mubr.bf16.gmra.mrb[20].mxu1 %v279_v62 }
 0x111   :  { %v262_v8 = vmax.f32 %v221_v3, 0.0  ;;  %v225_v9 = vadd.f32 %v224_v7, %v1754_v37 }
 0x112   :  { %v263_v10 = vmax.f32 %v223_v6, 0.0 }
 0x113   :  { %v264_v11 = vmax.f32 %v225_v9, 0.0 }
 0x114   :  { %v281_v12 = vpack.c.bf16 %v263_v10, %v261_v5 }
 0x115   :  { %v282_v13 = vpack.c.bf16 %v264_v11, %v262_v8  ;;  %v228_v14 = vpop.f32.mrb[28].mxu0 }
 0x116   :  { %v229_v15 = vadd.f32 %v228_v14, %v1751_v36  ;;  %v230_v16 = vpop.f32.mrb[29].mxu0 }
 0x117   :  { %v231_v17 = vadd.f32 %v230_v16, %v1754_v37  ;;  %v232_v18 = vpop.f32.mrb[30].mxu0  ;;  %581 = vmatprep.mubr.bf16.mxu1 %v282_v13 }
 0x118   :  { %v265_v19 = vmax.f32 %v229_v15, 0.0  ;;  %v233_v20 = vadd.f32 %v232_v18, %v1751_v36  ;;  %v234_v21 = vpop.f32.mrb[31].mxu0  ;;  %582 = vmatmul.mubr.bf16.gmra.mrb[24].mxu1 %v281_v12  ;;  %v1430_v36 = vld [vmem:[%s1989_s5 + $0xf4] ss:$8 sps:$4 sm:$0xff]  }
 0x119   :  { %v266_v22 = vmax.f32 %v231_v17, 0.0  ;;  %v235_v23 = vadd.f32 %v234_v21, %v1754_v37  ;;  %v1428_v37 = vld [vmem:[%s1989_s5 + $0xf0] ss:$8 sps:$4 sm:$0xff]   ;;  %884 = vmatprep.subr.bf16.mxu0 %v1430_v36 }
 0x11a   :  { %v267_v24 = vmax.f32 %v233_v20, 0.0  ;;  %885 = vmatpush1.bf16.msra.mxu0 %v1428_v37 }
 0x11b   :  { %v268_v25 = vmax.f32 %v235_v23, 0.0 }
 0x11c   :  { %v283_v26 = vpack.c.bf16 %v267_v24, %v265_v19 }
 0x11d   :  { %v284_v28 = vpack.c.bf16 %v268_v25, %v266_v22 }
 0x11f   :  { %591 = vmatprep.mubr.bf16.mxu1 %v284_v28 }
 0x120   :  { %592 = vmatmul.mubr.bf16.gmra.mrb[28].mxu1 %v283_v26 }
 0x1bb   :  { %v523_v39 = vpop.f32.mrb[0].mxu1 }
 0x1bc   :  { %v524_v40 = vadd.f32 %v523_v39, %v1804_v34  ;;  %v525_v41 = vpop.f32.mrb[1].mxu1 }
 0x1bd   :  { %v526_v42 = vadd.f32 %v525_v41, %v1807_v38  ;;  %v527_v43 = vpop.f32.mrb[2].mxu1 }
 0x1be   :  { %v528_v44 = vadd.f32 %v527_v43, %v1804_v34  ;;  %v529_v45 = vpop.f32.mrb[3].mxu1  ;;  %v602_v47 = vmax.f32 %v524_v40, 0.0 }
 0x1bf   :  { %v530_v46 = vadd.f32 %v529_v45, %v1807_v38  ;;  %v603_v49 = vmax.f32 %v526_v42, 0.0 }
 0x1c0   :  { %v604_v48 = vmax.f32 %v528_v44, 0.0 }
 0x1c1   :  { %v605_v50 = vmax.f32 %v530_v46, 0.0 }
 0x1c2   :  { %v634_v51 = vpack.c.bf16 %v604_v48, %v602_v47 }
 0x1c3   :  { %v635_v52 = vpack.c.bf16 %v605_v50, %v603_v49  ;;  %v533_v53 = vpop.f32.mrb[4].mxu1 }
 0x1c4   :  { %v534_v54 = vadd.f32 %v533_v53, %v1804_v34  ;;  %v535_v55 = vpop.f32.mrb[5].mxu1 }
 0x1c5   :  { %v536_v56 = vadd.f32 %v535_v55, %v1807_v38  ;;  %v537_v57 = vpop.f32.mrb[6].mxu1  ;;  %886 = vmatprep.mubr.bf16.mxu0 %v635_v52 }
 0x1c6   :  { %v538_v58 = vadd.f32 %v537_v57, %v1804_v34  ;;  %v539_v59 = vpop.f32.mrb[7].mxu1  ;;  %887 = vmatmul.mubr.bf16.vlgmr.msra.gmra.mrb[32].mxu0 %v634_v51  ;;  %v606_v61 = vmax.f32 %v534_v54, 0.0 }
 0x1c7   :  { %v540_v60 = vadd.f32 %v539_v59, %v1807_v38  ;;  %v607_v63 = vmax.f32 %v536_v56, 0.0 }
 0x1c8   :  { %v608_v62 = vmax.f32 %v538_v58, 0.0 }
 0x1c9   :  { %v609_v0 = vmax.f32 %v540_v60, 0.0 }
 0x1ca   :  { %v636_v1 = vpack.c.bf16 %v608_v62, %v606_v61 }
 0x1cb   :  { %v637_v2 = vpack.c.bf16 %v609_v0, %v607_v63  ;;  %v543_v3 = vpop.f32.mrb[8].mxu1 }
 0x1cc   :  { %v544_v4 = vadd.f32 %v543_v3, %v1804_v34  ;;  %v545_v5 = vpop.f32.mrb[9].mxu1 }
 0x1cd   :  { %v546_v6 = vadd.f32 %v545_v5, %v1807_v38  ;;  %v547_v7 = vpop.f32.mrb[10].mxu1  ;;  %896 = vmatprep.mubr.bf16.mxu0 %v637_v2 }
 0x1ce   :  { %v548_v8 = vadd.f32 %v547_v7, %v1804_v34  ;;  %v549_v9 = vpop.f32.mrb[11].mxu1  ;;  %897 = vmatmul.mubr.bf16.gmra.mrb[36].mxu0 %v636_v1  ;;  %v610_v11 = vmax.f32 %v544_v4, 0.0 }
 0x1cf   :  { %v550_v10 = vadd.f32 %v549_v9, %v1807_v38  ;;  %v611_v13 = vmax.f32 %v546_v6, 0.0 }
 0x1d0   :  { %v612_v12 = vmax.f32 %v548_v8, 0.0 }
 0x1d1   :  { %v613_v14 = vmax.f32 %v550_v10, 0.0 }
 0x1d2   :  { %v638_v15 = vpack.c.bf16 %v612_v12, %v610_v11 }
 0x1d3   :  { %v639_v16 = vpack.c.bf16 %v613_v14, %v611_v13  ;;  %v553_v17 = vpop.f32.mrb[12].mxu1 }
 0x1d4   :  { %v554_v18 = vadd.f32 %v553_v17, %v1804_v34  ;;  %v555_v19 = vpop.f32.mrb[13].mxu1 }
 0x1d5   :  { %v556_v20 = vadd.f32 %v555_v19, %v1807_v38  ;;  %v557_v21 = vpop.f32.mrb[14].mxu1  ;;  %906 = vmatprep.mubr.bf16.mxu0 %v639_v16 }
 0x1d6   :  { %v614_v22 = vmax.f32 %v554_v18, 0.0  ;;  %v558_v23 = vadd.f32 %v557_v21, %v1804_v34  ;;  %v559_v24 = vpop.f32.mrb[15].mxu1  ;;  %907 = vmatmul.mubr.bf16.gmra.mrb[40].mxu0 %v638_v15 }
 0x1d7   :  { %v615_v25 = vmax.f32 %v556_v20, 0.0  ;;  %v560_v26 = vadd.f32 %v559_v24, %v1807_v38 }
 0x1d8   :  { %v616_v28 = vmax.f32 %v558_v23, 0.0 }
 0x1d9   :  { %v617_v29 = vmax.f32 %v560_v26, 0.0 }
 0x1da   :  { %v640_v31 = vpack.c.bf16 %v616_v28, %v614_v22 }
 0x1db   :  { %v641_v36 = vpack.c.bf16 %v617_v29, %v615_v25  ;;  %v563_v37 = vpop.f32.mrb[16].mxu1 }
 0x1dc   :  { %v564_v32 = vadd.f32 %v563_v37, %v1804_v34  ;;  %v565_v39 = vpop.f32.mrb[17].mxu1  ;;  %v999_v37 = vld [vmem:[%s1994_s7] sm:$0x3] }
 0x1dd   :  { %v566_v40 = vadd.f32 %v565_v39, %v1807_v38  ;;  %v567_v41 = vpop.f32.mrb[18].mxu1  ;;  %916 = vmatprep.mubr.bf16.mxu0 %v641_v36 }
 0x1de   :  { %v618_v42 = vmax.f32 %v564_v32, 0.0  ;;  %v568_v43 = vadd.f32 %v567_v41, %v1804_v34  ;;  %v569_v44 = vpop.f32.mrb[19].mxu1  ;;  %917 = vmatmul.mubr.bf16.gmra.mrb[44].mxu0 %v640_v31  ;;  %v14_v31 = vstv %s1992_s8  ;;  %v1858_v41 = vrot.slane %v999_v37, %v1742_v33 }
 0x1df   :  { %v619_v45 = vmax.f32 %v566_v40, 0.0  ;;  %v570_v46 = vadd.f32 %v569_v44, %v1807_v38  ;;  %15 = vst [vmem:[#allocation2] sm:$0x1] %v14_v31  ;;  %v1862_v44 = vrot.slane %v999_v37, %v1748_v35 }
 0x1e0   :  { %v620_v47 = vmax.f32 %v568_v43, 0.0 }
 0x1e1   :  { %v621_v48 = vmax.f32 %v570_v46, 0.0 }
 0x1e2   :  { %v642_v49 = vpack.c.bf16 %v620_v47, %v618_v42 }
 0x1e3   :  { %v643_v50 = vpack.c.bf16 %v621_v48, %v619_v45  ;;  %v573_v51 = vpop.f32.mrb[20].mxu1 }
 0x1e4   :  { %v574_v52 = vadd.f32 %v573_v51, %v1804_v34  ;;  %v575_v53 = vpop.f32.mrb[21].mxu1 }
 0x1e5   :  { %v576_v54 = vadd.f32 %v575_v53, %v1807_v38  ;;  %v577_v55 = vpop.f32.mrb[22].mxu1  ;;  %926 = vmatprep.mubr.bf16.mxu0 %v643_v50 }
 0x1e6   :  { %v622_v56 = vmax.f32 %v574_v52, 0.0  ;;  %v578_v57 = vadd.f32 %v577_v55, %v1804_v34  ;;  %v579_v58 = vpop.f32.mrb[23].mxu1  ;;  %927 = vmatmul.mubr.bf16.gmra.mrb[48].mxu0 %v642_v49 }
 0x1e7   :  { %v623_v59 = vmax.f32 %v576_v54, 0.0  ;;  %v580_v60 = vadd.f32 %v579_v58, %v1807_v38 }
 0x1e8   :  { %v624_v61 = vmax.f32 %v578_v57, 0.0 }
 0x1e9   :  { %v625_v62 = vmax.f32 %v580_v60, 0.0 }
 0x1ea   :  { %v644_v63 = vpack.c.bf16 %v624_v61, %v622_v56 }
 0x1eb   :  { %v645_v0 = vpack.c.bf16 %v625_v62, %v623_v59  ;;  %v583_v1 = vpop.f32.mrb[24].mxu1 }
 0x1ec   :  { %v584_v2 = vadd.f32 %v583_v1, %v1804_v34  ;;  %v585_v3 = vpop.f32.mrb[25].mxu1 }
 0x1ed   :  { %v586_v4 = vadd.f32 %v585_v3, %v1807_v38  ;;  %v587_v5 = vpop.f32.mrb[26].mxu1  ;;  %936 = vmatprep.mubr.bf16.mxu0 %v645_v0 }
 0x1ee   :  { %v626_v6 = vmax.f32 %v584_v2, 0.0  ;;  %v588_v7 = vadd.f32 %v587_v5, %v1804_v34  ;;  %v589_v8 = vpop.f32.mrb[27].mxu1  ;;  %937 = vmatmul.mubr.bf16.gmra.mrb[52].mxu0 %v644_v63 }
 0x1ef   :  { %v627_v9 = vmax.f32 %v586_v4, 0.0  ;;  %v590_v10 = vadd.f32 %v589_v8, %v1807_v38 }
 0x1f0   :  { %v628_v11 = vmax.f32 %v588_v7, 0.0 }
 0x1f1   :  { %v629_v12 = vmax.f32 %v590_v10, 0.0 }
 0x1f2   :  { %v646_v13 = vpack.c.bf16 %v628_v11, %v626_v6 }
 0x1f3   :  { %v647_v14 = vpack.c.bf16 %v629_v12, %v627_v9  ;;  %v593_v15 = vpop.f32.mrb[28].mxu1 }
 0x1f4   :  { %v594_v16 = vadd.f32 %v593_v15, %v1804_v34  ;;  %v595_v17 = vpop.f32.mrb[29].mxu1 }
 0x1f5   :  { %v596_v18 = vadd.f32 %v595_v17, %v1807_v38  ;;  %v597_v19 = vpop.f32.mrb[30].mxu1  ;;  %946 = vmatprep.mubr.bf16.mxu0 %v647_v14 }
 0x1f6   :  { %v630_v20 = vmax.f32 %v594_v16, 0.0  ;;  %v598_v21 = vadd.f32 %v597_v19, %v1804_v34  ;;  %v599_v22 = vpop.f32.mrb[31].mxu1  ;;  %947 = vmatmul.mubr.bf16.gmra.mrb[56].mxu0 %v646_v13  ;;  %v682_v34 = vld [vmem:[%s1993_s6] sm:$0x3] }
 0x1f7   :  { %v631_v23 = vmax.f32 %v596_v18, 0.0  ;;  %v600_v24 = vadd.f32 %v599_v22, %v1807_v38  ;;  %v1848_v36 = vrot.slane %v682_v34, %v1742_v33  ;;  %v1851_v38 = vrot.slane %v682_v34, %v1748_v35 }
 0x1f8   :  { %v632_v25 = vmax.f32 %v598_v21, 0.0 }
 0x1f9   :  { %v633_v26 = vmax.f32 %v600_v24, 0.0 }
 0x1fa   :  { %v648_v28 = vpack.c.bf16 %v632_v25, %v630_v20 }
 0x1fb   :  { %v649_v29 = vpack.c.bf16 %v633_v26, %v631_v23 }
 0x1fd   :  { %956 = vmatprep.mubr.bf16.mxu0 %v649_v29 }
 0x1fe   :  { %957 = vmatmul.mubr.bf16.gmra.mrb[60].mxu0 %v648_v28 }
 0x299   :  { %v888_v32 = vpop.f32.mrb[32].mxu0 }
 0x29a   :  { %v889_v39 = vadd.f32 %v888_v32, %v1848_v36  ;;  %v890_v40 = vpop.f32.mrb[33].mxu0 }
 0x29b   :  { %v891_v42 = vadd.f32 %v890_v40, %v1851_v38  ;;  %v892_v43 = vpop.f32.mrb[34].mxu0 }
 0x29c   :  { %v967_v45 = vmax.f32 %v889_v39, 0.0  ;;  %v893_v46 = vadd.f32 %v892_v43, %v1848_v36  ;;  %v894_v47 = vpop.f32.mrb[35].mxu0 }
 0x29d   :  { %v968_v48 = vmax.f32 %v891_v42, 0.0  ;;  %v895_v49 = vadd.f32 %v894_v47, %v1851_v38 }
 0x29e   :  { %v969_v50 = vmax.f32 %v893_v46, 0.0  ;;  %v1011_v51 = vmul.f32 %v1858_v41, %v967_v45 }
 0x29f   :  { %v970_v52 = vmax.f32 %v895_v49, 0.0  ;;  %v1012_v53 = vmul.f32 %v1862_v44, %v968_v48 }
 0x2a0   :  { %v1013_v54 = vmul.f32 %v1858_v41, %v969_v50 }
 0x2a1   :  { %v1014_v55 = vmul.f32 %v1862_v44, %v970_v52  ;;  %v898_v56 = vpop.f32.mrb[36].mxu0  ;;  %v1043_v35 = vadd.f32 %v1012_v53, %v1011_v51 }
 0x2a2   :  { %v899_v57 = vadd.f32 %v898_v56, %v1848_v36  ;;  %v900_v58 = vpop.f32.mrb[37].mxu0 }
 0x2a3   :  { %v901_v59 = vadd.f32 %v900_v58, %v1851_v38  ;;  %v902_v60 = vpop.f32.mrb[38].mxu0  ;;  %1044 = vadd.xlane.f32.xlu0 %v1043_v35  ;;  %v1046_v61 = vadd.f32 %v1014_v55, %v1013_v54 }
 0x2a4   :  { %v971_v62 = vmax.f32 %v899_v57, 0.0  ;;  %v903_v63 = vadd.f32 %v902_v60, %v1848_v36  ;;  %v904_v0 = vpop.f32.mrb[39].mxu0 }
 0x2a5   :  { %v972_v1 = vmax.f32 %v901_v59, 0.0  ;;  %v905_v2 = vadd.f32 %v904_v0, %v1851_v38 }
 0x2a6   :  { %v973_v3 = vmax.f32 %v903_v63, 0.0  ;;  %v1015_v4 = vmul.f32 %v1858_v41, %v971_v62 }
 0x2a7   :  { %v974_v5 = vmax.f32 %v905_v2, 0.0  ;;  %1047 = vadd.xlane.f32.xlu0 %v1046_v61  ;;  %v1016_v6 = vmul.f32 %v1862_v44, %v972_v1 }
 0x2a8   :  { %v1017_v7 = vmul.f32 %v1858_v41, %v973_v3 }
 0x2a9   :  { %v1018_v8 = vmul.f32 %v1862_v44, %v974_v5  ;;  %v908_v9 = vpop.f32.mrb[40].mxu0  ;;  %v1049_v10 = vadd.f32 %v1016_v6, %v1015_v4 }
 0x2aa   :  { %v909_v11 = vadd.f32 %v908_v9, %v1848_v36  ;;  %v910_v12 = vpop.f32.mrb[41].mxu0 }
 0x2ab   :  { %v911_v13 = vadd.f32 %v910_v12, %v1851_v38  ;;  %v912_v14 = vpop.f32.mrb[42].mxu0  ;;  %1050 = vadd.xlane.f32.xlu1 %v1049_v10  ;;  %v1052_v15 = vadd.f32 %v1018_v8, %v1017_v7 }
 0x2ac   :  { %v975_v16 = vmax.f32 %v909_v11, 0.0  ;;  %v913_v17 = vadd.f32 %v912_v14, %v1848_v36  ;;  %v914_v18 = vpop.f32.mrb[43].mxu0  ;;  %v1091_v11 = vld [vmem:[#allocation2] sm:$0x1] }
 0x2ad   :  { %v976_v19 = vmax.f32 %v911_v13, 0.0  ;;  %v915_v20 = vadd.f32 %v914_v18, %v1851_v38 }
 0x2ae   :  { %v1019_v21 = vmul.f32 %v1858_v41, %v975_v16  ;;  %v977_v22 = vmax.f32 %v913_v17, 0.0 }
 0x2af   :  { %v1020_v23 = vmul.f32 %v1862_v44, %v976_v19  ;;  %v978_v24 = vmax.f32 %v915_v20, 0.0  ;;  %1053 = vadd.xlane.f32.xlu1 %v1052_v15 }
 0x2b0   :  { %v1021_v25 = vmul.f32 %v1858_v41, %v977_v22 }
 0x2b1   :  { %v1022_v26 = vmul.f32 %v1862_v44, %v978_v24  ;;  %v918_v28 = vpop.f32.mrb[44].mxu0  ;;  %v1055_v29 = vadd.f32 %v1020_v23, %v1019_v21 }
 0x2b2   :  { %v919_v31 = vadd.f32 %v918_v28, %v1848_v36  ;;  %v920_v34 = vpop.f32.mrb[45].mxu0 }
 0x2b3   :  { %v921_v37 = vadd.f32 %v920_v34, %v1851_v38  ;;  %1056 = vadd.xlane.f32.xlu0 %v1055_v29  ;;  %v922_v32 = vpop.f32.mrb[46].mxu0  ;;  %v1058_v39 = vadd.f32 %v1022_v26, %v1021_v25 }
 0x2b4   :  { %v979_v40 = vmax.f32 %v919_v31, 0.0  ;;  %v923_v42 = vadd.f32 %v922_v32, %v1848_v36  ;;  %v924_v43 = vpop.f32.mrb[47].mxu0 }
 0x2b5   :  { %v980_v45 = vmax.f32 %v921_v37, 0.0  ;;  %1059 = vadd.xlane.f32.xlu1 %v1058_v39  ;;  %v925_v46 = vadd.f32 %v924_v43, %v1851_v38 }
 0x2b6   :  { %v1023_v47 = vmul.f32 %v1858_v41, %v979_v40  ;;  %v981_v48 = vmax.f32 %v923_v42, 0.0 }
 0x2b7   :  { %v1024_v49 = vmul.f32 %v1862_v44, %v980_v45  ;;  %v982_v50 = vmax.f32 %v925_v46, 0.0 }
 0x2b8   :  { %v1025_v51 = vmul.f32 %v1858_v41, %v981_v48 }
 0x2b9   :  { %v1026_v52 = vmul.f32 %v1862_v44, %v982_v50  ;;  %v928_v53 = vpop.f32.mrb[48].mxu0  ;;  %v1061_v54 = vadd.f32 %v1024_v49, %v1023_v47 }
 0x2ba   :  { %v929_v55 = vadd.f32 %v928_v53, %v1848_v36  ;;  %v930_v56 = vpop.f32.mrb[49].mxu0 }
 0x2bb   :  { %v931_v35 = vadd.f32 %v930_v56, %v1851_v38  ;;  %1062 = vadd.xlane.f32.xlu0 %v1061_v54  ;;  %v932_v57 = vpop.f32.mrb[50].mxu0  ;;  %v1064_v58 = vadd.f32 %v1026_v52, %v1025_v51 }
 0x2bc   :  { %v983_v59 = vmax.f32 %v929_v55, 0.0  ;;  %v933_v60 = vadd.f32 %v932_v57, %v1848_v36  ;;  %v934_v61 = vpop.f32.mrb[51].mxu0 }
 0x2bd   :  { %v984_v62 = vmax.f32 %v931_v35, 0.0  ;;  %v935_v63 = vadd.f32 %v934_v61, %v1851_v38 }
 0x2be   :  { %v1027_v0 = vmul.f32 %v1858_v41, %v983_v59  ;;  %v985_v1 = vmax.f32 %v933_v60, 0.0 }
 0x2bf   :  { %v1028_v2 = vmul.f32 %v1862_v44, %v984_v62  ;;  %v986_v3 = vmax.f32 %v935_v63, 0.0  ;;  %1065 = vadd.xlane.f32.xlu0 %v1064_v58 }
 0x2c0   :  { %v1029_v4 = vmul.f32 %v1858_v41, %v985_v1 }
 0x2c1   :  { %v1030_v5 = vmul.f32 %v1862_v44, %v986_v3  ;;  %v938_v6 = vpop.f32.mrb[52].mxu0  ;;  %v1067_v7 = vadd.f32 %v1028_v2, %v1027_v0 }
 0x2c2   :  { %v939_v8 = vadd.f32 %v938_v6, %v1848_v36  ;;  %v940_v9 = vpop.f32.mrb[53].mxu0 }
 0x2c3   :  { %v941_v10 = vadd.f32 %v940_v9, %v1851_v38  ;;  %1068 = vadd.xlane.f32.xlu0 %v1067_v7  ;;  %v942_v12 = vpop.f32.mrb[54].mxu0  ;;  %v1070_v13 = vadd.f32 %v1030_v5, %v1029_v4 }
 0x2c4   :  { %v987_v14 = vmax.f32 %v939_v8, 0.0  ;;  %v943_v15 = vadd.f32 %v942_v12, %v1848_v36  ;;  %v944_v16 = vpop.f32.mrb[55].mxu0  ;;  %v1927_v12 = vand.u32 127, %v64_v27 }
 0x2c5   :  { %v988_v17 = vmax.f32 %v941_v10, 0.0  ;;  %v945_v18 = vadd.f32 %v944_v16, %v1851_v38 }
 0x2c6   :  { %v1031_v19 = vmul.f32 %v1858_v41, %v987_v14  ;;  %1094 = vperm.xlu1 %1328, %v1091_v11   ;;  %v989_v20 = vmax.f32 %v943_v15, 0.0  ;;  %v1139_v14 = vadd.s32 4294967288, %v1927_v12  ;;  %v1146_v15 = vadd.s32 4294967280, %v1927_v12 }
 0x2c7   :  { %v1032_v21 = vmul.f32 %v1862_v44, %v988_v17  ;;  %1071 = vadd.xlane.f32.xlu0 %v1070_v13  ;;  %v990_v22 = vmax.f32 %v945_v18, 0.0 }
 0x2c8   :  { %v1033_v23 = vmul.f32 %v1858_v41, %v989_v20  ;;  %v1142_v27 = vsub.s32 %v1139_v14, %v1733_v30 }
 0x2c9   :  { %v1034_v24 = vmul.f32 %v1862_v44, %v990_v22  ;;  %v948_v25 = vpop.f32.mrb[56].mxu0  ;;  %v1073_v26 = vadd.f32 %v1032_v21, %v1031_v19  ;;  %v1137_v19 = vsub.s32 %v1927_v12, %v1733_v30  ;;  %v1149_v21 = vsub.s32 %v1146_v15, %v1733_v30 }
 0x2ca   :  { %v949_v28 = vadd.f32 %v948_v25, %v1848_v36  ;;  %v950_v29 = vpop.f32.mrb[57].mxu0 }
 0x2cb   :  { %v951_v31 = vadd.f32 %v950_v29, %v1851_v38  ;;  %1074 = vadd.xlane.f32.xlu0 %v1073_v26  ;;  %v952_v34 = vpop.f32.mrb[58].mxu0  ;;  %v1076_v37 = vadd.f32 %v1034_v24, %v1033_v23  ;;  %v1153_v23 = vadd.s32 4294967272, %v1927_v12  ;;  %v1160_v26 = vadd.s32 4294967264, %v1927_v12 }
 0x2cc   :  { %v991_v32 = vmax.f32 %v949_v28, 0.0  ;;  %v953_v39 = vadd.f32 %v952_v34, %v1848_v36  ;;  %v954_v40 = vpop.f32.mrb[59].mxu0 }
 0x2cd   :  { %v992_v42 = vmax.f32 %v951_v31, 0.0  ;;  %v955_v43 = vadd.f32 %v954_v40, %v1851_v38  ;;  %v1156_v31 = vsub.s32 %v1153_v23, %v1733_v30  ;;  %v1163_v40 = vsub.s32 %v1160_v26, %v1733_v30 }
 0x2ce   :  { %v1035_v45 = vmul.f32 %v1858_v41, %v991_v32  ;;  %v993_v46 = vmax.f32 %v953_v39, 0.0 }
 0x2cf   :  { %v1036_v47 = vmul.f32 %v1862_v44, %v992_v42  ;;  %v994_v48 = vmax.f32 %v955_v43, 0.0  ;;  %v1174_v43 = vadd.s32 4294967248, %v1927_v12 }
 0x2d0   :  { %v1037_v49 = vmul.f32 %v1858_v41, %v993_v46 }
 0x2d1   :  { %v1038_v50 = vmul.f32 %v1862_v44, %v994_v48  ;;  %v958_v51 = vpop.f32.mrb[60].mxu0  ;;  %v1079_v52 = vadd.f32 %v1036_v47, %v1035_v45 }
 0x2d2   :  { %v959_v53 = vadd.f32 %v958_v51, %v1848_v36  ;;  %v960_v54 = vpop.f32.mrb[61].mxu0  ;;  %v1181_v51 = vadd.s32 4294967240, %v1927_v12 }
 0x2d3   :  { %v961_v55 = vadd.f32 %v960_v54, %v1851_v38  ;;  %1080 = vadd.xlane.f32.xlu0 %v1079_v52  ;;  %v962_v56 = vpop.f32.mrb[62].mxu0  ;;  %v1082_v35 = vadd.f32 %v1038_v50, %v1037_v49  ;;  %v1177_v50 = vsub.s32 %v1174_v43, %v1733_v30  ;;  %v1188_v54 = vadd.s32 4294967232, %v1927_v12 }
 0x2d4   :  { %v995_v57 = vmax.f32 %v959_v53, 0.0  ;;  %v963_v58 = vadd.f32 %v962_v56, %v1848_v36  ;;  %v964_v59 = vpop.f32.mrb[63].mxu0  ;;  %v1195_v56 = vadd.s32 4294967224, %v1927_v12 }
 0x2d5   :  { %v996_v60 = vmax.f32 %v961_v55, 0.0  ;;  %v965_v61 = vadd.f32 %v964_v59, %v1851_v38 }
 0x2d6   :  { %v1039_v62 = vmul.f32 %v1858_v41, %v995_v57  ;;  %v997_v63 = vmax.f32 %v963_v58, 0.0  ;;  %v1184_v58 = vsub.s32 %v1181_v51, %v1733_v30 }
 0x2d7   :  { %v1040_v0 = vmul.f32 %v1862_v44, %v996_v60  ;;  %v998_v1 = vmax.f32 %v965_v61, 0.0  ;;  %1083 = vadd.xlane.f32.xlu0 %v1082_v35  ;;  %v1202_v35 = vadd.s32 4294967216, %v1927_v12  ;;  %v1191_v61 = vsub.s32 %v1188_v54, %v1733_v30 }
 0x2d8   :  { %v1041_v2 = vmul.f32 %v1858_v41, %v997_v63 }
 0x2d9   :  { %v1042_v3 = vmul.f32 %v1862_v44, %v998_v1  ;;  %v1085_v4 = vadd.f32 %v1040_v0, %v1039_v62  ;;  %v1198_v0 = vsub.s32 %v1195_v56, %v1733_v30 }
 0x2db   :  { %1086 = vadd.xlane.f32.xlu0 %v1085_v4  ;;  %v1088_v5 = vadd.f32 %v1042_v3, %v1041_v2  ;;  %v1209_v2 = vadd.s32 4294967208, %v1927_v12  ;;  %v1205_v4 = vsub.s32 %v1202_v35, %v1733_v30 }
 0x2df   :  { %1089 = vadd.xlane.f32.xlu0 %v1088_v5 }
 0x2ea   :  { %1077 = vadd.xlane.f32.xlu1 %v1076_v37  ;;  %v1167_v37 = vadd.s32 4294967256, %v1927_v12 }
 0x2ec   :  { %v1170_v47 = vsub.s32 %v1167_v37, %v1733_v30 }
 0x330   :  { %v1045_v36 = vpop.xlane.xlu0 %1044 }
 0x334   :  { %v1048_v6 = vpop.xlane.xlu0 %1047 }
 0x338   :  { %v1051_v7 = vpop.xlane.xlu1 %1050 }
 0x33c   :  { %v1054_v9 = vpop.xlane.xlu1 %1053 }
 0x340   :  { %v1057_v38 = vpop.xlane.xlu0 %1056 }
 0x342   :  { %v1060_v10 = vpop.xlane.xlu1 %1059 }
 0x346   :  { %v1095_v13 = vpop.permute.xlu1 %1094 }
 0x347   :  { %v1930_v44 = vrot.slane %v1095_v13, %v1742_v33  ;;  %v1212_v13 = vsub.s32 %v1209_v2, %v1733_v30 }
 0x348   :  { %v1063_v8 = vpop.xlane.xlu0 %1062 }
 0x349   :  { %v1101_v17 = vadd.f32 %v1930_v44, %v1045_v36  ;;  %v1102_v18 = vadd.f32 %v1930_v44, %v1048_v6  ;;  %v1103_v20 = vadd.f32 %v1930_v44, %v1051_v7  ;;  %v1104_v28 = vadd.f32 %v1930_v44, %v1054_v9 }
 0x34a   :  { %v1105_v32 = vadd.f32 %v1930_v44, %v1057_v38  ;;  %v1106_v45 = vadd.f32 %v1930_v44, %v1060_v10  ;;  %v1107_v53 = vadd.f32 %v1930_v44, %v1063_v8  ;;  %v1216_v36 = vadd.s32 4294967200, %v1927_v12 }
 0x34b   :  { %v1138_v33 = vrot.slane %v1101_v17, %v1137_v19  ;;  %v1143_v22 = vrot.slane %v1102_v18, %v1142_v27  ;;  %v1150_v25 = vrot.slane %v1103_v20, %v1149_v21  ;;  %v1157_v42 = vrot.slane %v1104_v28, %v1156_v31 }
 0x34c   :  { %v1066_v11 = vpop.xlane.xlu0 %1065  ;;  %v1164_v48 = vrot.slane %v1105_v32, %v1163_v40  ;;  %v1171_v55 = vrot.slane %v1106_v45, %v1170_v47  ;;  %v1178_v60 = vrot.slane %v1107_v53, %v1177_v50  ;;  %v1223_v7 = vadd.s32 4294967192, %v1927_v12 }
 0x34d   :  { %v1145_v29 = vsel %vm1144_vm3, %v1143_v22, %v1138_v33  ;;  %v1108_v59 = vadd.f32 %v1930_v44, %v1066_v11  ;;  %v1230_v38 = vadd.s32 4294967184, %v1927_v12  ;;  %v1237_v9 = vadd.s32 4294967176, %v1927_v12 }
 0x34e   :  { %v1152_v39 = vsel %vm1151_vm4, %v1150_v25, %v1145_v29  ;;  %v1219_v14 = vsub.s32 %v1216_v36, %v1733_v30  ;;  %v1226_v18 = vsub.s32 %v1223_v7, %v1733_v30 }
 0x34f   :  { %v1159_v46 = vsel %vm1158_vm5, %v1157_v42, %v1152_v39  ;;  %v1185_v6 = vrot.slane %v1108_v59, %v1184_v58  ;;  %v1233_v27 = vsub.s32 %v1230_v38, %v1733_v30  ;;  %v1240_v33 = vsub.s32 %v1237_v9, %v1733_v30 }
 0x350   :  { %v1069_v41 = vpop.xlane.xlu0 %1068  ;;  %v1166_v52 = vsel %vm1165_vm6, %v1164_v48, %v1159_v46 }
 0x351   :  { %v1173_v57 = vsel %vm1172_vm7, %v1171_v55, %v1166_v52  ;;  %v1109_v62 = vadd.f32 %v1930_v44, %v1069_v41 }
 0x352   :  { %v1180_v3 = vsel %vm1179_vm8, %v1178_v60, %v1173_v57 }
 0x353   :  { %v1192_v8 = vrot.slane %v1109_v62, %v1191_v61  ;;  %v1187_v10 = vsel %vm1186_vm9, %v1185_v6, %v1180_v3 }
 0x354   :  { %v1072_v16 = vpop.xlane.xlu0 %1071 }
 0x355   :  { %v1110_v1 = vadd.f32 %v1930_v44, %v1072_v16  ;;  %v1194_v20 = vsel %vm1193_vm10, %v1192_v8, %v1187_v10 }
 0x357   :  { %v1199_v11 = vrot.slane %v1110_v1, %v1198_v0 }
 0x358   :  { %v1075_v24 = vpop.xlane.xlu0 %1074 }
 0x359   :  { %v1111_v5 = vadd.f32 %v1930_v44, %v1075_v24  ;;  %v1201_v22 = vsel %vm1200_vm11, %v1199_v11, %v1194_v20 }
 0x35b   :  { %v1206_v41 = vrot.slane %v1111_v5, %v1205_v4 }
 0x35d   :  { %v1208_v25 = vsel %vm1207_vm12, %v1206_v41, %v1201_v22 }
 0x360   :  { %v1081_v34 = vpop.xlane.xlu0 %1080 }
 0x361   :  { %v1113_v15 = vadd.f32 %v1930_v44, %v1081_v34 }
 0x363   :  { %v1220_v26 = vrot.slane %v1113_v15, %v1219_v14 }
 0x364   :  { %v1084_v49 = vpop.xlane.xlu0 %1083 }
 0x365   :  { %v1114_v19 = vadd.f32 %v1930_v44, %v1084_v49 }
 0x367   :  { %v1227_v28 = vrot.slane %v1114_v19, %v1226_v18 }
 0x368   :  { %v1087_v63 = vpop.xlane.xlu0 %1086 }
 0x369   :  { %v1115_v21 = vadd.f32 %v1930_v44, %v1087_v63 }
 0x36b   :  { %v1234_v31 = vrot.slane %v1115_v21, %v1233_v27 }
 0x36c   :  { %v1090_v16 = vpop.xlane.xlu0 %1089 }
 0x36d   :  { %v1116_v23 = vadd.f32 %v1930_v44, %v1090_v16 }
 0x36f   :  { %v1241_v37 = vrot.slane %v1116_v23, %v1240_v33 }
 0x377   :  { %v1078_v17 = vpop.xlane.xlu1 %1077 }
 0x378   :  { %v1112_v12 = vadd.f32 %v1930_v44, %v1078_v17 }
 0x37a   :  { %v1213_v24 = vrot.slane %v1112_v12, %v1212_v13 }
 0x37c   :  { %v1215_v29 = vsel %vm1214_vm13, %v1213_v24, %v1208_v25 }
 0x37d   :  { %v1222_v34 = vsel %vm1221_vm14, %v1220_v26, %v1215_v29 }
 0x37e   :  { %v1229_v32 = vsel %vm1228_vm15, %v1227_v28, %v1222_v34 }
 0x37f   :  { %v1236_v30 = vsel %vm1235_vm0, %v1234_v31, %v1229_v32 }
 0x380   :  { %v1243_v39 = vsel %vm1242_vm1, %v1241_v37, %v1236_v30 }
 0x381   :  { %1245 = vst [vmem:[%s1995_s9] sm:$0x1] %v1243_v39 }

</bundles_post_ra>
